<compile_context>
chip_gen: v5e
topology: v5e:2x2
jax: 0.10.0
libtpu: 0.0.40
codegen_flags: <defaults>
</compile_context>

<pallas_src>
import jax
import jax.numpy as jnp
from jax.experimental import pallas as pl
from jax.experimental.pallas import tpu as pltpu

# ---- static configuration (small, consistent with the module) -------------
N = 4            # batch (chosen so N*C == 128 -> lane-dense)
C = 32           # channels
T = 16           # sequence length
K = 2            # kernel_size
DIL = 2          # dilation "i"
PAD = (K - 1) * DIL
NC = N * C       # lane-packed width (128)
EPS = 1e-5


def tab_kernel(x_ref, w1_ref, sh1_ref, w2_ref, sh2_ref, out_ref):
    """Fused Temporal_Aware_Block forward (inference).

    x_ref   : (T, N*C)      time on sublanes, batch*channels packed on lanes
    w*_ref  : (K*N*C, N*C)  BN-folded, tap-fused, block-diagonal conv weights
    sh*_ref : (1, N*C)      folded conv-bias + BN shift
    out_ref : (T, N*C)      x * sigmoid(block(x))
    """
    x = x_ref[...]                                      # (T, NC) in vregs

    # One causal-validity mask per distinct tap shift, from a cheap 2-D iota
    # (a few VPU bundles; no (NT,NT) constants, no MXU work).
    t_idx = jax.lax.broadcasted_iota(jnp.int32, (T, NC), 0)
    shifts = sorted({(K - 1 - k) * DIL for k in range(K - 1)})
    masks = {s: t_idx >= s for s in shifts}

    def conv_bn_relu(a, w_ref, sh_ref):
        # Causal time shift on the XLU (sublane roll) + zero the first s rows;
        # then fuse all K taps into a single MXU matmul by concatenating the
        # shifted copies along lanes (contraction depth K*N*C).
        parts = []
        for k in range(K - 1):
            s = (K - 1 - k) * DIL
            rolled = pltpu.roll(a, shift=s, axis=0)      # row t <- row t-s (circular)
            parts.append(jnp.where(masks[s], rolled, jnp.float32(0.0)))
        parts.append(a)                                  # tap K-1: zero shift
        stacked = jnp.concatenate(parts, axis=1) if len(parts) > 1 else parts[0]
        y = jnp.dot(stacked, w_ref[...], preferred_element_type=jnp.float32)
        # conv bias and inference BatchNorm are pre-folded into w / sh.
        return jnp.maximum(y + sh_ref[...], 0.0)

    h = conv_bn_relu(x, w1_ref, sh1_ref)
    # TODO(synk): SpatialDropout1D is identity in eval mode; training-mode
    # channel dropout and batch-statistics BN are not implemented here.
    h2 = conv_bn_relu(h, w2_ref, sh2_ref)

    out_ref[...] = (x * jax.nn.sigmoid(h2)).astype(out_ref.dtype)


# ------------------------- host-side weight prep ---------------------------
def _fold_bn_into_conv(w_kic, b, gamma, beta, mean, var):
    """Fold Conv1d bias + inference BatchNorm into the conv weights."""
    s = gamma / jnp.sqrt(var + EPS)              # per output channel
    t = beta - mean * s
    w_folded = w_kic * s[None, None, :]          # (K, C, C), scale out-channels
    shift = (b * s + t).reshape(1, C)
    return w_folded, shift


def _pack_weights(w_folded, shift):
    """(K,C,C) folded conv -> (K*N*C, N*C) tap-fused block-diagonal weight and
    (1, N*C) shift, matching the lane-packed activation layout."""
    eye_n = jnp.eye(N, dtype=w_folded.dtype)
    w_bd = jnp.einsum('kio,nm->knimo', w_folded, eye_n)      # (K, N, C, N, C)
    w_bd = w_bd.reshape(K * N * C, N * C)
    sh_p = jnp.tile(shift, (1, N))                           # (1, N*C)
    return w_bd, sh_p


@jax.jit
def temporal_aware_block(x_nct, w1_kic, b1, bn1, w2_kic, b2, bn2):
    """x_nct: (N, C, T) float32 (PyTorch layout).  bn* = (gamma, beta, mean, var).
    Returns (N, C, T)."""
    w1f, sh1 = _fold_bn_into_conv(w1_kic, b1, *bn1)
    w2f, sh2 = _fold_bn_into_conv(w2_kic, b2, *bn2)
    w1_bd, sh1_p = _pack_weights(w1f, sh1)
    w2_bd, sh2_p = _pack_weights(w2f, sh2)

    # NCT -> (T, N*C): time on sublanes, batch*channels packed on lanes so the
    # store is lane-dense (last dim a multiple of 128) and matmuls run at full
    # MXU lane width.  A full TIMNET stack would keep this layout end to end.
    x_p = jnp.transpose(x_nct, (2, 0, 1)).reshape(T, NC)

    vmem = pl.BlockSpec(memory_space=pltpu.MemorySpace.VMEM)
    out_p = pl.pallas_call(
        tab_kernel,
        out_shape=jax.ShapeDtypeStruct((T, NC), jnp.float32),
        in_specs=[vmem] * 5,
        out_specs=vmem,
        # Gridless single invocation (~300 KiB footprint, overhead bound).
    )(x_p, w1_bd, sh1_p, w2_bd, sh2_p)

    return jnp.transpose(out_p.reshape(T, N, C), (1, 2, 0))   # back to (N, C, T)


# ---------------------- pure-JAX reference (for checking) ------------------
def _causal_conv1d_ref(x_nct, w_oik, b, dil):
    pad = (w_oik.shape[-1] - 1) * dil
    xp = jnp.pad(x_nct, ((0, 0), (0, 0), (pad, 0)))
    y = jax.lax.conv_general_dilated(
        xp, w_oik, window_strides=(1,), padding="VALID",
        rhs_dilation=(dil,), dimension_numbers=("NCH", "OIH", "NCH"))
    return y + b[None, :, None]


def _bn_relu_ref(x_nct, gamma, beta, mean, var):
    y = (x_nct - mean[None, :, None]) / jnp.sqrt(var + EPS)[None, :, None]
    y = y * gamma[None, :, None] + beta[None, :, None]
    return jnp.maximum(y, 0.0)


def ref_forward(x_nct, w1_oik, b1, bn1, w2_oik, b2, bn2):
    g1, be1, m1, v1 = bn1
    g2, be2, m2, v2 = bn2
    h = _bn_relu_ref(_causal_conv1d_ref(x_nct, w1_oik, b1, DIL), g1, be1, m1, v1)
    h = _bn_relu_ref(_causal_conv1d_ref(h, w2_oik, b2, DIL), g2, be2, m2, v2)
    return x_nct * jax.nn.sigmoid(h)


if __name__ == "__main__":
    key = jax.random.PRNGKey(0)
    ks = jax.random.split(key, 13)

    # Conv weights in kernel layout (K, C_in, C_out); biases (C,)
    w1_kic = 0.3 * jax.random.normal(ks[0], (K, C, C), jnp.float32)
    b1 = 0.1 * jax.random.normal(ks[1], (C,), jnp.float32)
    w2_kic = 0.3 * jax.random.normal(ks[2], (K, C, C), jnp.float32)
    b2 = 0.1 * jax.random.normal(ks[3], (C,), jnp.float32)

    # BatchNorm params (inference semantics)
    g1 = 1.0 + 0.1 * jax.random.normal(ks[4], (C,), jnp.float32)
    be1 = 0.1 * jax.random.normal(ks[5], (C,), jnp.float32)
    m1 = 0.1 * jax.random.normal(ks[6], (C,), jnp.float32)
    v1 = 0.5 + jax.random.uniform(ks[7], (C,), jnp.float32)
    g2 = 1.0 + 0.1 * jax.random.normal(ks[8], (C,), jnp.float32)
    be2 = 0.1 * jax.random.normal(ks[9], (C,), jnp.float32)
    m2 = 0.1 * jax.random.normal(ks[10], (C,), jnp.float32)
    v2 = 0.5 + jax.random.uniform(ks[11], (C,), jnp.float32)

    # Input in PyTorch NCT layout
    x = jax.random.normal(ks[12], (N, C, T), jnp.float32)

    out = temporal_aware_block(x, w1_kic, b1, (g1, be1, m1, v1),
                               w2_kic, b2, (g2, be2, m2, v2))
    out = jax.block_until_ready(out)

    # Verify against an independent pure-JAX (lax.conv) reference
    w1_oik = jnp.transpose(w1_kic, (2, 1, 0))   # (O, I, K) PyTorch conv layout
    w2_oik = jnp.transpose(w2_kic, (2, 1, 0))
    ref = ref_forward(x, w1_oik, b1, (g1, be1, m1, v1),
                      w2_oik, b2, (g2, be2, m2, v2))
    assert out.shape == (N, C, T)
    err = float(jnp.max(jnp.abs(out - ref)))
    assert jnp.allclose(out, ref, atol=5e-4, rtol=5e-4), f"max err {err}"

    print("KERNEL_OK")
</pallas_src>

<mosaic_0001>
module attributes {stable_mosaic.version = 11 : i64} {
  func.func @tab_kernel(%arg0: memref<16x128xf32, #tpu.memory_space<vmem>>, %arg1: memref<256x128xf32, #tpu.memory_space<vmem>>, %arg2: memref<1x128xf32, #tpu.memory_space<vmem>>, %arg3: memref<256x128xf32, #tpu.memory_space<vmem>>, %arg4: memref<1x128xf32, #tpu.memory_space<vmem>>, %arg5: memref<16x128xf32, #tpu.memory_space<vmem>>) attributes {dimension_semantics = [], scalar_prefetch = 0 : i64, scratch_operands = 0 : i64, tpu.core_type = #tpu.core_type<tc>} {
    %c0 = arith.constant 0 : index
    %c0_0 = arith.constant 0 : index
    %0 = vector.load %arg0[%c0, %c0_0] : memref<16x128xf32, #tpu.memory_space<vmem>>, vector<16x128xf32>
    %1 = tpu.iota {dimensions = array<i32: 0>} : vector<16x128xi32>
    %c2_i32 = arith.constant 2 : i32
    %2 = vector.broadcast %c2_i32 : i32 to vector<16x128xi32>
    %3 = arith.cmpi sge, %1, %2 : vector<16x128xi32>
    %c2_i32_1 = arith.constant 2 : i32
    %4 = tpu.dynamic_rotate %0 by %c2_i32_1 dim 0 : vector<16x128xf32>, i32 -> vector<16x128xf32>
    %cst = arith.constant 0.000000e+00 : f32
    %5 = vector.broadcast %cst : f32 to vector<16x128xf32>
    %6 = arith.select %3, %4, %5 : vector<16x128xi1>, vector<16x128xf32>
    %7 = tpu.concatenate %6, %0 in 1 : vector<16x128xf32>, vector<16x128xf32> -> vector<16x256xf32>
    %c0_2 = arith.constant 0 : index
    %c0_3 = arith.constant 0 : index
    %8 = vector.load %arg1[%c0_2, %c0_3] : memref<256x128xf32, #tpu.memory_space<vmem>>, vector<256x128xf32>
    %cst_4 = arith.constant dense<0.000000e+00> : vector<16x128xf32>
    %9 = tpu.matmul %7, %8, %cst_4 {dimension_numbers = #tpu.dot_dimension_numbers<[1], [0], [0], [1], [0, 0, 1, 1], [], []>} : vector<16x256xf32>, vector<256x128xf32>, vector<16x128xf32> -> vector<16x128xf32>
    %c0_5 = arith.constant 0 : index
    %c0_6 = arith.constant 0 : index
    %10 = vector.load %arg2[%c0_5, %c0_6] : memref<1x128xf32, #tpu.memory_space<vmem>>, vector<1x128xf32>
    %11 = vector.broadcast %10 : vector<1x128xf32> to vector<16x128xf32>
    %12 = arith.addf %9, %11 : vector<16x128xf32>
    %cst_7 = arith.constant 0.000000e+00 : f32
    %13 = vector.broadcast %cst_7 : f32 to vector<16x128xf32>
    %14 = arith.maximumf %12, %13 : vector<16x128xf32>
    %c2_i32_8 = arith.constant 2 : i32
    %15 = tpu.dynamic_rotate %14 by %c2_i32_8 dim 0 : vector<16x128xf32>, i32 -> vector<16x128xf32>
    %cst_9 = arith.constant 0.000000e+00 : f32
    %16 = vector.broadcast %cst_9 : f32 to vector<16x128xf32>
    %17 = arith.select %3, %15, %16 : vector<16x128xi1>, vector<16x128xf32>
    %18 = tpu.concatenate %17, %14 in 1 : vector<16x128xf32>, vector<16x128xf32> -> vector<16x256xf32>
    %c0_10 = arith.constant 0 : index
    %c0_11 = arith.constant 0 : index
    %19 = vector.load %arg3[%c0_10, %c0_11] : memref<256x128xf32, #tpu.memory_space<vmem>>, vector<256x128xf32>
    %cst_12 = arith.constant dense<0.000000e+00> : vector<16x128xf32>
    %20 = tpu.matmul %18, %19, %cst_12 {dimension_numbers = #tpu.dot_dimension_numbers<[1], [0], [0], [1], [0, 0, 1, 1], [], []>} : vector<16x256xf32>, vector<256x128xf32>, vector<16x128xf32> -> vector<16x128xf32>
    %c0_13 = arith.constant 0 : index
    %c0_14 = arith.constant 0 : index
    %21 = vector.load %arg4[%c0_13, %c0_14] : memref<1x128xf32, #tpu.memory_space<vmem>>, vector<1x128xf32>
    %22 = vector.broadcast %21 : vector<1x128xf32> to vector<16x128xf32>
    %23 = arith.addf %20, %22 : vector<16x128xf32>
    %cst_15 = arith.constant 0.000000e+00 : f32
    %24 = vector.broadcast %cst_15 : f32 to vector<16x128xf32>
    %25 = arith.maximumf %23, %24 : vector<16x128xf32>
    %26 = arith.negf %25 : vector<16x128xf32>
    %27 = math.exp %26 : vector<16x128xf32>
    %cst_16 = arith.constant 1.000000e+00 : f32
    %28 = vector.broadcast %cst_16 : f32 to vector<16x128xf32>
    %29 = arith.addf %28, %27 : vector<16x128xf32>
    %30 = arith.divf %28, %29 : vector<16x128xf32>
    %31 = arith.mulf %0, %30 : vector<16x128xf32>
    %c0_17 = arith.constant 0 : index
    %c0_18 = arith.constant 0 : index
    %32 = vector.load %arg5[%c0_17, %c0_18] : memref<16x128xf32, #tpu.memory_space<vmem>>, vector<16x128xf32>
    tpu.vector_store %arg5[%c0_17, %c0_18], %31 {strides = array<i32>} : memref<16x128xf32, #tpu.memory_space<vmem>>, vector<16x128xf32>,
    return
  }
}

</mosaic_0001>

<bundles_post_ra>
// kernel: temporal_aware_block.1
= control target key start
LH: loop header
LB: loop body
LE: loop exit
PB: predicated region body
PF: predicated region fallthrough
CT: control target
= control target key end

     0   :  { %v22_v31 = vlaneseq  ;;  %s534_s1 = inlined_call_operand.vmem [shape: f32[256,128], index: 1, kind: input, shape index: {}]   ;;  %s535_s3 = inlined_call_operand.vmem [shape: f32[256,128], index: 3, kind: input, shape index: {}]   ;;  %s536_s2 = inlined_call_operand.vmem [shape: f32[1,128], index: 2, kind: input, shape index: {}]   ;;  %s537_s0 = inlined_call_operand.vmem [shape: f32[16,128], index: 0, kind: input, shape index: {}]   ;;  %s538_s4 = inlined_call_operand.vmem [shape: f32[1,128], index: 4, kind: input, shape index: {}]   ;;  %s539_s5 = inlined_call_operand.vmem [shape: f32[16,128], index: 5, kind: output, shape index: {}]  }
   0x1   :  { %v49_v0 = vld [vmem:[%s534_s1 + $0x78] sm:$0xff]  ;;  %v48_v1 = vld [vmem:[%s534_s1 + $0x70] sm:$0xff]  ;;  %v47_v4 = vld [vmem:[%s534_s1 + $0x68] sm:$0xff] }
   0x2   :  { %v65_v2 = vld [vmem:[%s534_s1 + $0xf8] sm:$0xff]  ;;  %70 = vmatpush.msra.mxu0 %v49_v0  ;;  %v64_v3 = vld [vmem:[%s534_s1 + $0xf0] sm:$0xff]  ;;  %v63_v5 = vld [vmem:[%s534_s1 + $0xe8] sm:$0xff]  ;;  %v425_v42 = vshrl.u32 %v22_v31, 7 }
   0x3   :  { %93 = vmatpush.msra.mxu1 %v65_v2  ;;  %v46_v6 = vld [vmem:[%s534_s1 + $0x60] sm:$0xff]  ;;  %v45_v8 = vld [vmem:[%s534_s1 + $0x58] sm:$0xff]  ;;  %v44_v10 = vld [vmem:[%s534_s1 + $0x50] sm:$0xff] }
   0x4   :  { %71 = vmatpush.msra.mxu0 %v48_v1  ;;  %v62_v7 = vld [vmem:[%s534_s1 + $0xe0] sm:$0xff]  ;;  %v61_v9 = vld [vmem:[%s534_s1 + $0xd8] sm:$0xff]  ;;  %v60_v11 = vld [vmem:[%s534_s1 + $0xd0] sm:$0xff]  ;;  %vm29_vm0 = vcmp.lt.s32.totalorder %v425_v42, 2  ;;  %vm25_vm1 = vcmp.ge.s32.totalorder %v425_v42, 2 }
   0x5   :  { %94 = vmatpush.msra.mxu1 %v64_v3  ;;  %v43_v12 = vld [vmem:[%s534_s1 + $0x48] sm:$0xff]  ;;  %v155_v14 = vld [vmem:[%s535_s3 + $0xf8] sm:$0xff]  ;;  %v154_v15 = vld [vmem:[%s535_s3 + $0xf0] sm:$0xff] }
   0x6   :  { %72 = vmatpush.msra.mxu0 %v47_v4  ;;  %v59_v13 = vld [vmem:[%s534_s1 + $0xc8] sm:$0xff]  ;;  %v42_v16 = vld [vmem:[%s534_s1 + $0x40] sm:$0xff]  ;;  %183 = vmatpush.msra.mxu3 %v155_v14  ;;  %v139_v19 = vld [vmem:[%s535_s3 + $0x78] sm:$0xff] }
   0x7   :  { %95 = vmatpush.msra.mxu1 %v63_v5  ;;  %v58_v17 = vld [vmem:[%s534_s1 + $0xc0] sm:$0xff]  ;;  %v153_v18 = vld [vmem:[%s535_s3 + $0xe8] sm:$0xff]  ;;  %v41_v20 = vld [vmem:[%s534_s1 + $0x38] sm:$0xff]  ;;  %160 = vmatpush.msra.mxu2 %v139_v19 }
   0x8   :  { %73 = vmatpush.msra.mxu0 %v46_v6  ;;  %v57_v21 = vld [vmem:[%s534_s1 + $0xb8] sm:$0xff]  ;;  %184 = vmatpush.msra.mxu3 %v154_v15  ;;  %v138_v22 = vld [vmem:[%s535_s3 + $0x70] sm:$0xff]  ;;  %v152_v23 = vld [vmem:[%s535_s3 + $0xe0] sm:$0xff] }
   0x9   :  { %96 = vmatpush.msra.mxu1 %v62_v7  ;;  %v137_v24 = vld [vmem:[%s535_s3 + $0x68] sm:$0xff]  ;;  %v40_v25 = vld [vmem:[%s534_s1 + $0x30] sm:$0xff]  ;;  %161 = vmatpush.msra.mxu2 %v138_v22  ;;  %v151_v27 = vld [vmem:[%s535_s3 + $0xd8] sm:$0xff] }
   0xa   :  { %74 = vmatpush.msra.mxu0 %v45_v8  ;;  %v56_v26 = vld [vmem:[%s534_s1 + $0xb0] sm:$0xff]  ;;  %185 = vmatpush.msra.mxu3 %v153_v18  ;;  %v136_v28 = vld [vmem:[%s535_s3 + $0x60] sm:$0xff]  ;;  %v39_v29 = vld [vmem:[%s534_s1 + $0x28] sm:$0xff] }
   0xb   :  { %97 = vmatpush.msra.mxu1 %v61_v9  ;;  %v55_v30 = vld [vmem:[%s534_s1 + $0xa8] sm:$0xff]  ;;  %162 = vmatpush.msra.mxu2 %v137_v24  ;;  %v150_v32 = vld [vmem:[%s535_s3 + $0xd0] sm:$0xff]  ;;  %v135_v33 = vld [vmem:[%s535_s3 + $0x58] sm:$0xff] }
   0xc   :  { %75 = vmatpush.msra.mxu0 %v44_v10  ;;  %186 = vmatpush.msra.mxu3 %v152_v23  ;;  %v38_v34 = vld [vmem:[%s534_s1 + $0x20] sm:$0xff]  ;;  %v37_v36 = vld [vmem:[%s534_s1 + $0x18] sm:$0xff]  ;;  %v149_v37 = vld [vmem:[%s535_s3 + $0xc8] sm:$0xff] }
   0xd   :  { %98 = vmatpush.msra.mxu1 %v60_v11  ;;  %v54_v35 = vld [vmem:[%s534_s1 + $0xa0] sm:$0xff]  ;;  %163 = vmatpush.msra.mxu2 %v136_v28  ;;  %v134_v38 = vld [vmem:[%s535_s3 + $0x50] sm:$0xff]  ;;  %v53_v39 = vld [vmem:[%s534_s1 + $0x98] sm:$0xff] }
   0xe   :  { %76 = vmatpush.msra.mxu0 %v43_v12  ;;  %187 = vmatpush.msra.mxu3 %v151_v27  ;;  %v418_v40 = vld [vmem:[%s537_s0] sm:$0xff]  ;;  %v423_v41 = vld [vmem:[%s537_s0 + $0x8] sm:$0xff]  ;;  %v36_v45 = vld [vmem:[%s534_s1 + $0x10] sm:$0xff] }
   0xf   :  { %99 = vmatpush.msra.mxu1 %v59_v13  ;;  %164 = vmatpush.msra.mxu2 %v135_v33  ;;  %v148_v43 = vld [vmem:[%s535_s3 + $0xc0] sm:$0xff]  ;;  %v133_v44 = vld [vmem:[%s535_s3 + $0x48] sm:$0xff]  ;;  %v52_v46 = vld [vmem:[%s534_s1 + $0x90] sm:$0xff]  ;;  %v27_v47 = vrot.slane %v418_v40, 6  ;;  %v28_v48 = vrot.slane %v423_v41, 6 }
  0x10   :  { %77 = vmatpush.msra.mxu0 %v42_v16  ;;  %188 = vmatpush.msra.mxu3 %v150_v32  ;;  %v147_v49 = vld [vmem:[%s535_s3 + $0xb8] sm:$0xff]  ;;  %v35_v50 = vld [vmem:[%s534_s1 + $0x8] sm:$0xff]  ;;  %v146_v52 = vld [vmem:[%s535_s3 + $0xb0] sm:$0xff] }
  0x11   :  { %100 = vmatpush.msra.mxu1 %v58_v17  ;;  %165 = vmatpush.msra.mxu2 %v134_v38  ;;  %v51_v51 = vld [vmem:[%s534_s1 + $0x88] sm:$0xff]  ;;  %v34_v53 = vld [vmem:[%s534_s1] sm:$0xff]  ;;  %v31_v55 = vsel %vm29_vm0, %v28_v48, %v27_v47  ;;  %v30_v58 = vsel %vm29_vm0, %v27_v47, %v28_v48  ;;  %v143_v59 = vld [vmem:[%s535_s3 + $0x98] sm:$0xff] }
  0x12   :  { %78 = vmatpush.msra.mxu0 %v41_v20  ;;  %189 = vmatpush.msra.mxu3 %v149_v37  ;;  %v50_v54 = vld [vmem:[%s534_s1 + $0x80] sm:$0xff]  ;;  %v145_v56 = vld [vmem:[%s535_s3 + $0xa8] sm:$0xff]  ;;  %v142_v61 = vld [vmem:[%s535_s3 + $0x90] sm:$0xff] }
  0x13   :  { %101 = vmatpush.msra.mxu1 %v57_v21  ;;  %166 = vmatpush.msra.mxu2 %v133_v44  ;;  %v144_v57 = vld [vmem:[%s535_s3 + $0xa0] sm:$0xff]  ;;  %v131_v62 = vld [vmem:[%s535_s3 + $0x38] sm:$0xff]  ;;  %v141_v63 = vld [vmem:[%s535_s3 + $0x88] sm:$0xff] }
  0x14   :  { %79 = vmatpush.msra.mxu0 %v40_v25  ;;  %190 = vmatpush.msra.mxu3 %v148_v43  ;;  %v132_v60 = vld [vmem:[%s535_s3 + $0x40] sm:$0xff]  ;;  %v130_v0 = vld [vmem:[%s535_s3 + $0x30] sm:$0xff]  ;;  %v129_v2 = vld [vmem:[%s535_s3 + $0x28] sm:$0xff] }
  0x15   :  { %102 = vmatpush.msra.mxu1 %v56_v26  ;;  %167 = vmatpush.msra.mxu2 %v132_v60  ;;  %v140_v1 = vld [vmem:[%s535_s3 + $0x80] sm:$0xff]  ;;  %v127_v4 = vld [vmem:[%s535_s3 + $0x18] sm:$0xff]  ;;  %v126_v5 = vld [vmem:[%s535_s3 + $0x10] sm:$0xff] }
  0x16   :  { %80 = vmatpush.msra.mxu0 %v39_v29  ;;  %191 = vmatpush.msra.mxu3 %v147_v49  ;;  %v128_v3 = vld [vmem:[%s535_s3 + $0x20] sm:$0xff]  ;;  %v125_v6 = vld [vmem:[%s535_s3 + $0x8] sm:$0xff] }
  0x17   :  { %103 = vmatpush.msra.mxu1 %v55_v30  ;;  %168 = vmatpush.msra.mxu2 %v131_v62  ;;  %v124_v7 = vld [vmem:[%s535_s3] sm:$0xff] }
  0x18   :  { %81 = vmatpush.msra.mxu0 %v38_v34  ;;  %192 = vmatpush.msra.mxu3 %v146_v52  ;;  %v258_v8 = vld [vmem:[%s536_s2] ss:$0 sm:$0xff] }
  0x19   :  { %104 = vmatpush.msra.mxu1 %v54_v35  ;;  %169 = vmatpush.msra.mxu2 %v130_v0  ;;  %v259_v23 = vld [vmem:[%s538_s4] ss:$0 sm:$0xff] }
  0x1a   :  { %82 = vmatpush.msra.mxu0 %v37_v36  ;;  %193 = vmatpush.msra.mxu3 %v145_v56 }
  0x1b   :  { %105 = vmatpush.msra.mxu1 %v53_v39  ;;  %170 = vmatpush.msra.mxu2 %v129_v2 }
  0x1c   :  { %83 = vmatpush.msra.mxu0 %v36_v45  ;;  %194 = vmatpush.msra.mxu3 %v144_v57 }
  0x1d   :  { %106 = vmatpush.msra.mxu1 %v52_v46  ;;  %171 = vmatpush.msra.mxu2 %v128_v3 }
  0x1e   :  { %84 = vmatpush.msra.mxu0 %v35_v50  ;;  %195 = vmatpush.msra.mxu3 %v143_v59 }
  0x1f   :  { %107 = vmatpush.msra.mxu1 %v51_v51  ;;  %172 = vmatpush.msra.mxu2 %v127_v4 }
  0x20   :  { %85 = vmatpush.msra.mxu0 %v34_v53  ;;  %196 = vmatpush.msra.mxu3 %v142_v61 }
  0x21   :  { %108 = vmatpush.msra.mxu1 %v50_v54  ;;  %254 = vmatmul.msk.f32.vlgmr.msra.gmra.mxu0 %vm25_vm1, %v31_v55 }
  0x22   :  { %109 = vmatmul.f32.vlgmr.msra.gmra.mxu1 %v418_v40  ;;  %197 = vmatpush.msra.mxu3 %v141_v63 }
  0x23   :  { %173 = vmatpush.msra.mxu2 %v126_v5 }
  0x24   :  { %198 = vmatpush.msra.mxu3 %v140_v1 }
  0x25   :  { %174 = vmatpush.msra.mxu2 %v125_v6 }
  0x27   :  { %175 = vmatpush.msra.mxu2 %v124_v7 }
  0x29   :  { %89 = vmatmul.f32.gmra.mxu0 %v30_v58 }
  0x2a   :  { %112 = vmatmul.f32.gmra.mxu1 %v423_v41 }
  0x9e   :  { %v87_v9 = vpop.f32.mrf.mxu0 }
  0x9f   :  { %v110_v10 = vpop.f32.mrf.mxu1  ;;  %v88_v11 = vadd.f32 %v258_v8, %v87_v9 }
  0xa1   :  { %v111_v12 = vadd.f32 %v110_v10, %v88_v11 }
  0xa3   :  { %v116_v13 = vmax.f32 %v111_v12, 0.0 }
  0xa5   :  { %199 = vmatmul.f32.vlgmr.msra.gmra.mxu3 %v116_v13  ;;  %v118_v19 = vrot.slane %v116_v13, 6 }
  0xa6   :  { %v90_v14 = vpop.f32.mrf.mxu0 }
  0xa7   :  { %v113_v15 = vpop.f32.mrf.mxu1  ;;  %v91_v16 = vadd.f32 %v258_v8, %v90_v14 }
  0xa9   :  { %v114_v17 = vadd.f32 %v113_v15, %v91_v16 }
  0xab   :  { %v117_v18 = vmax.f32 %v114_v17, 0.0 }
  0xad   :  { %v119_v20 = vrot.slane %v117_v18, 6  ;;  %202 = vmatmul.f32.gmra.mxu3 %v117_v18 }
  0xaf   :  { %v121_v21 = vsel %vm29_vm0, %v119_v20, %v118_v19  ;;  %v120_v22 = vsel %vm29_vm0, %v118_v19, %v119_v20 }
  0xb0   :  { %255 = vmatmul.msk.f32.vlgmr.msra.gmra.mxu2 %vm25_vm1, %v121_v21 }
  0xb8   :  { %179 = vmatmul.f32.gmra.mxu2 %v120_v22 }
 0x128   :  { %v200_v24 = vpop.f32.mrf.mxu3 }
 0x130   :  { %v203_v32 = vpop.f32.mrf.mxu3 }
 0x133   :  { %v177_v25 = vpop.f32.mrf.mxu2 }
 0x134   :  { %v178_v26 = vadd.f32 %v259_v23, %v177_v25 }
 0x136   :  { %v201_v27 = vadd.f32 %v200_v24, %v178_v26 }
 0x138   :  { %v206_v28 = vmax.f32 %v201_v27, 0.0 }
 0x13a   :  { %v256_v29 = vmul.f32 -1.442695, %v206_v28 }
 0x13b   :  { %v180_v30 = vpop.f32.mrf.mxu2 }
 0x13c   :  { %260 = vpow2.f32 %v256_v29  ;;  %v181_v31 = vadd.f32 %v259_v23, %v180_v30 }
 0x13e   :  { %v204_v33 = vadd.f32 %v203_v32, %v181_v31 }
 0x140   :  { %v207_v34 = vmax.f32 %v204_v33, 0.0 }
 0x142   :  { %v261_v35 = vpop.eup %260  ;;  %v257_v36 = vmul.f32 -1.442695, %v207_v34 }
 0x143   :  { %v214_v37 = vadd.f32 1.0, %v261_v35 }
 0x144   :  { %262 = vpow2.f32 %v257_v36 }
 0x145   :  { %264 = vrcp.f32 %v214_v37  ;;  %v227_v45 = vand.u32 2147483648, %v214_v37  ;;  %v225_v47 = vand.u32 2147483647, %v214_v37  ;;  %vm221_vm3 = vweird.f32 %v214_v37 }
 0x147   :  { %v228_v50 = vor.u32 1.1754944e-38, %v227_v45  ;;  %vm226_vm5 = vcmp.eq.f32.partialorder %v225_v47, 8.507059e+37 }
 0x14a   :  { %v263_v38 = vpop.eup %262 }
 0x14b   :  { %v265_v39 = vpop.eup %264  ;;  %v215_v42 = vadd.f32 1.0, %v263_v38 }
 0x14c   :  { %v217_v43 = vmul.f32 %v265_v39, %v214_v37  ;;  %vm222_vm2 = vweird.f32 %v265_v39 }
 0x14d   :  { %266 = vrcp.f32 %v215_v42  ;;  %vm223_vm4 = vmor %vm221_vm3, %vm222_vm2  ;;  %v242_v56 = vand.u32 2147483648, %v215_v42  ;;  %v240_v58 = vand.u32 2147483647, %v215_v42  ;;  %vm236_vm7 = vweird.f32 %v215_v42 }
 0x14e   :  { %v218_v44 = vsub.f32 1.0, %v217_v43 }
 0x14f   :  { %v243_v60 = vor.u32 1.1754944e-38, %v242_v56  ;;  %vm241_vm9 = vcmp.eq.f32.partialorder %v240_v58, 8.507059e+37 }
 0x150   :  { %v219_v46 = vmul.f32 %v265_v39, %v218_v44 }
 0x152   :  { %v220_v48 = vadd.f32 %v265_v39, %v219_v46 }
 0x153   :  { %v267_v49 = vpop.eup %266 }
 0x154   :  { %v224_v51 = vsel %vm223_vm4, %v265_v39, %v220_v48  ;;  %v232_v52 = vmul.f32 %v267_v49, %v215_v42  ;;  %vm237_vm6 = vweird.f32 %v267_v49 }
 0x155   :  { %v229_v53 = vsel %vm226_vm5, %v228_v50, %v224_v51  ;;  %vm238_vm8 = vmor %vm236_vm7, %vm237_vm6 }
 0x156   :  { %v246_v54 = vmul.f32 %v229_v53, %v418_v40  ;;  %v233_v55 = vsub.f32 1.0, %v232_v52 }
 0x158   :  { %248 = vst [vmem:[%s539_s5] sm:$0xff] %v246_v54  ;;  %v234_v57 = vmul.f32 %v267_v49, %v233_v55 }
 0x15a   :  { %v235_v59 = vadd.f32 %v267_v49, %v234_v57 }
 0x15c   :  { %v239_v61 = vsel %vm238_vm8, %v267_v49, %v235_v59 }
 0x15d   :  { %v244_v62 = vsel %vm241_vm9, %v243_v60, %v239_v61 }
 0x15e   :  { %v247_v63 = vmul.f32 %v244_v62, %v423_v41 }
 0x160   :  { %249 = vst [vmem:[%s539_s5 + $0x8] sm:$0xff] %v247_v63 }

</bundles_post_ra>
